<compile_context>
chip_gen: v7x
topology: tpu7x:2x2x1
jax: 0.10.0
libtpu: 0.0.40
codegen_flags: <defaults>
</compile_context>

<pallas_src>
import functools

import jax
import jax.numpy as jnp
import numpy as np
from jax import lax
from jax.experimental import pallas as pl
from jax.experimental.pallas import tpu as pltpu


def _mhsa_kernel(x_ref, w_ref, b_ref, pos_ref, o_ref, *, heads, d,
                 mm_dtype, approx_recip):
    C = heads * d
    x = x_ref[0]                       # (C, N)   one batch element
    w = w_ref[...]                     # (3C, C)  stacked [Wq; Wk; Wv]
    b = b_ref[...]                     # (3C, 1)  stacked [bq; bk; bv]

    # Fused QKV projection: one MXU pass with 3C result rows, f32 accumulation.
    qkv = jnp.dot(w, x, preferred_element_type=jnp.float32) + b   # (3C, N) f32

    outs = []
    for h in range(heads):             # static, unrolled (heads == 4)
        q = qkv[h * d:(h + 1) * d, :].astype(mm_dtype)                 # (d, N)
        k = qkv[C + h * d:C + (h + 1) * d, :].astype(mm_dtype)         # (d, N)
        v = qkv[2 * C + h * d:2 * C + (h + 1) * d, :].astype(mm_dtype) # (d, N)
        pos_h = pos_ref[h * d:(h + 1) * d, :]                          # (d, N)

        # energy^T[m, n] = sum_i k[i,m]*q[i,n] + q[i,m]*pos[i,n]
        #               = (q^T k + pos^T q)[n, m]
        # One matmul of contraction depth 2d instead of two depth-d matmuls.
        lhs = jnp.concatenate([k, q], axis=0)        # (2d, N)  key side
        rhs = jnp.concatenate([q, pos_h], axis=0)    # (2d, N)  query side
        energy_t = lax.dot_general(
            lhs, rhs, (((0,), (0,)), ((), ())),
            preferred_element_type=jnp.float32)      # (N_key, N_query), f32

        # Numerically-stable softmax over the key axis (= sublane axis here),
        # element-wise math in f32, normalization deferred.
        e_max = jnp.max(energy_t, axis=0, keepdims=True)               # (1, N)
        p_t = jnp.exp(energy_t - e_max)                                # (N, N)
        l = jnp.sum(p_t, axis=0, keepdims=True)                        # (1, N)

        # out_un[i, n] = sum_m v[i, m] * p_t[m, n]   -- plain matmul, no .T
        out_un = jnp.dot(v, p_t.astype(mm_dtype),
                         preferred_element_type=jnp.float32)           # (d, N)
        outs.append(out_un * pl.reciprocal(l, approx=approx_recip))    # (d, N)

    o_ref[0] = jnp.concatenate(outs, axis=0).astype(o_ref.dtype)       # (C, N)


def mhsa_pallas(x, wq, bq, wk, bk, wv, bv, rel_h, rel_w, heads,
                *, mm_dtype=jnp.float32):
    """x: (B, C, W, H) NCHW float32. Returns (B, C, W, H) float32.

    mm_dtype controls the MXU operand dtype (jnp.bfloat16 recommended on
    v6e/v7x); accumulation and softmax element-wise math stay in float32.
    """
    B, C, W, H = x.shape
    N = W * H
    d = C // heads
    mm_dtype = jnp.dtype(mm_dtype)
    f32 = jnp.dtype(jnp.float32)

    x_flat = x.reshape(B, C, N).astype(mm_dtype)
    # Stack the three 1x1-conv weights / biases -> single fused QKV projection.
    w_qkv = jnp.concatenate([wq, wk, wv], axis=0).astype(mm_dtype)          # (3C, C)
    b_qkv = jnp.concatenate([bq, bk, bv], axis=0).reshape(3 * C, 1).astype(f32)
    # (1, heads, d, 1, H) + (1, heads, d, W, 1) -> (heads*d, N) == (C, N)
    pos = (rel_h + rel_w).reshape(C, N).astype(mm_dtype)

    kernel = functools.partial(
        _mhsa_kernel, heads=heads, d=d, mm_dtype=mm_dtype,
        approx_recip=(mm_dtype != f32))

    flops = int(B * (2 * (3 * C) * C * N                  # fused QKV matmul
                     + heads * (2 * (2 * d) * N * N       # fused cc+cp energy
                                + 2 * d * N * N)))        # v @ p
    transcendentals = int(B * heads * N * N)
    bytes_accessed = int(sum(int(a.size) * a.dtype.itemsize
                             for a in (x_flat, w_qkv, b_qkv, pos))
                         + B * C * N * 4)

    out = pl.pallas_call(
        kernel,
        out_shape=jax.ShapeDtypeStruct((B, C, N), jnp.float32),
        grid_spec=pltpu.PrefetchScalarGridSpec(
            num_scalar_prefetch=0,
            grid=(B,),
            in_specs=[
                pl.BlockSpec((1, C, N), lambda b: (b, 0, 0)),   # x[b]
                # Grid-invariant operands: constant index maps -> blocks stay
                # resident in VMEM, no re-DMA across batch steps.
                pl.BlockSpec((3 * C, C), lambda b: (0, 0)),     # fused W_qkv
                pl.BlockSpec((3 * C, 1), lambda b: (0, 0)),     # fused b_qkv
                pl.BlockSpec((C, N), lambda b: (0, 0)),         # pos (all heads)
            ],
            out_specs=pl.BlockSpec((1, C, N), lambda b: (b, 0, 0)),
        ),
        compiler_params=pltpu.CompilerParams(
            dimension_semantics=("parallel",)),
        cost_estimate=pl.CostEstimate(
            flops=flops, transcendentals=transcendentals,
            bytes_accessed=bytes_accessed),
    )(x_flat, w_qkv, b_qkv, pos)

    return out.reshape(B, C, W, H)


def mhsa_ref(x, wq, bq, wk, bk, wv, bv, rel_h, rel_w, heads):
    """Pure-JAX reference mirroring the PyTorch forward exactly."""
    B, C, W, H = x.shape
    N = W * H
    d = C // heads
    xf = x.reshape(B, C, N)
    q = (jnp.einsum("oc,bcn->bon", wq, xf) + bq[None, :, None]).reshape(B, heads, d, N)
    k = (jnp.einsum("oc,bcn->bon", wk, xf) + bk[None, :, None]).reshape(B, heads, d, N)
    v = (jnp.einsum("oc,bcn->bon", wv, xf) + bv[None, :, None]).reshape(B, heads, d, N)
    cc = jnp.einsum("bhdn,bhdm->bhnm", q, k)               # q^T k
    pos = (rel_h + rel_w).reshape(1, heads, d, N)
    cp = jnp.einsum("hdn,bhdm->bhnm", pos[0], q)           # pos^T q
    energy = cc + cp
    attn = jax.nn.softmax(energy, axis=-1)
    out = jnp.einsum("bhdm,bhnm->bhdn", v, attn)           # v @ attn^T
    return out.reshape(B, C, W, H)


if __name__ == "__main__":
    # Small config consistent with MHSA(n_dims=C, width=W, height=H, heads=4)
    B, C, W, H, heads = 2, 32, 8, 8, 4
    d = C // heads

    key = jax.random.PRNGKey(0)
    keys = jax.random.split(key, 9)
    x = jax.random.normal(keys[0], (B, C, W, H), dtype=jnp.float32)

    # 1x1 conv weights (C_out, C_in) and biases (C,)
    wq = 0.1 * jax.random.normal(keys[1], (C, C), dtype=jnp.float32)
    wk = 0.1 * jax.random.normal(keys[2], (C, C), dtype=jnp.float32)
    wv = 0.1 * jax.random.normal(keys[3], (C, C), dtype=jnp.float32)
    bq = 0.1 * jax.random.normal(keys[4], (C,), dtype=jnp.float32)
    bk = 0.1 * jax.random.normal(keys[5], (C,), dtype=jnp.float32)
    bv = 0.1 * jax.random.normal(keys[6], (C,), dtype=jnp.float32)
    # relative position embeddings: (1, heads, d, 1, H) and (1, heads, d, W, 1)
    rel_h = jax.random.normal(keys[7], (1, heads, d, 1, H), dtype=jnp.float32)
    rel_w = jax.random.normal(keys[8], (1, heads, d, W, 1), dtype=jnp.float32)

    ref = mhsa_ref(x, wq, bq, wk, bk, wv, bv, rel_h, rel_w, heads)

    # Full-f32 path: exact semantics, tight tolerance.
    out = mhsa_pallas(x, wq, bq, wk, bk, wv, bv, rel_h, rel_w, heads)
    out = jax.block_until_ready(out)
    np.testing.assert_allclose(np.asarray(out), np.asarray(ref),
                               rtol=1e-4, atol=1e-4)

    # bf16 MXU-operand fast path (v6e/v7x): f32 accumulation, loose sanity check.
    out_bf16 = mhsa_pallas(x, wq, bq, wk, bk, wv, bv, rel_h, rel_w, heads,
                           mm_dtype=jnp.bfloat16)
    out_bf16 = jax.block_until_ready(out_bf16)
    max_err = float(np.max(np.abs(np.asarray(out_bf16) - np.asarray(ref))))
    assert max_err < 0.5, f"bf16 path error too large: {max_err}"

    print("KERNEL_OK")
</pallas_src>

<mosaic_0001>
module attributes {stable_mosaic.version = 11 : i64} {
  func.func @_mhsa_kernel(%arg0: i32, %arg1: memref<1x32x64xf32, #tpu.memory_space<vmem>>, %arg2: memref<96x32xf32, #tpu.memory_space<vmem>>, %arg3: memref<96x1xf32, #tpu.memory_space<vmem>>, %arg4: memref<32x64xf32, #tpu.memory_space<vmem>>, %arg5: memref<1x32x64xf32, #tpu.memory_space<vmem>>) attributes {dimension_semantics = [#tpu.dimension_semantics<parallel>], iteration_bounds = array<i64: 2>, scalar_prefetch = 0 : i64, scratch_operands = 0 : i64, tpu.core_type = #tpu.core_type<tc>, window_params = [{transform_indices = @transform_0, window_bounds = array<i64: 1, 32, 64>}, {pipeline_mode = #tpu.pipeline_mode<synchronous>, transform_indices = @transform_1, window_bounds = array<i64: 96, 32>}, {pipeline_mode = #tpu.pipeline_mode<synchronous>, transform_indices = @transform_2, window_bounds = array<i64: 96, 1>}, {pipeline_mode = #tpu.pipeline_mode<synchronous>, transform_indices = @transform_3, window_bounds = array<i64: 32, 64>}, {transform_indices = @transform_4, window_bounds = array<i64: 1, 32, 64>}]} {
    %c0 = arith.constant 0 : index
    %c0_0 = arith.constant 0 : index
    %c0_1 = arith.constant 0 : index
    %0 = vector.load %arg1[%c0, %c0_0, %c0_1] : memref<1x32x64xf32, #tpu.memory_space<vmem>>, vector<1x32x64xf32>
    %1 = vector.shape_cast %0 : vector<1x32x64xf32> to vector<32x64xf32>
    %c0_2 = arith.constant 0 : index
    %c0_3 = arith.constant 0 : index
    %2 = vector.load %arg2[%c0_2, %c0_3] : memref<96x32xf32, #tpu.memory_space<vmem>>, vector<96x32xf32>
    %c0_4 = arith.constant 0 : index
    %c0_5 = arith.constant 0 : index
    %3 = vector.load %arg3[%c0_4, %c0_5] : memref<96x1xf32, #tpu.memory_space<vmem>>, vector<96x1xf32>
    %cst = arith.constant dense<0.000000e+00> : vector<96x64xf32>
    %4 = tpu.matmul %2, %1, %cst {dimension_numbers = #tpu.dot_dimension_numbers<[1], [0], [0], [1], [0, 0, 1, 1], [], []>} : vector<96x32xf32>, vector<32x64xf32>, vector<96x64xf32> -> vector<96x64xf32>
    %5 = vector.broadcast %3 : vector<96x1xf32> to vector<96x64xf32>
    %6 = arith.addf %4, %5 : vector<96x64xf32>
    %7 = vector.extract_strided_slice %6 {offsets = [0, 0], sizes = [8, 64], strides = [1, 1]} : vector<96x64xf32> to vector<8x64xf32>
    %8 = vector.extract_strided_slice %6 {offsets = [32, 0], sizes = [8, 64], strides = [1, 1]} : vector<96x64xf32> to vector<8x64xf32>
    %9 = vector.extract_strided_slice %6 {offsets = [64, 0], sizes = [8, 64], strides = [1, 1]} : vector<96x64xf32> to vector<8x64xf32>
    %c0_6 = arith.constant 0 : index
    %c0_7 = arith.constant 0 : index
    %10 = vector.load %arg4[%c0_6, %c0_7] : memref<32x64xf32, #tpu.memory_space<vmem>>, vector<8x64xf32>
    %11 = tpu.concatenate %8, %7 in 0 : vector<8x64xf32>, vector<8x64xf32> -> vector<16x64xf32>
    %12 = tpu.concatenate %7, %10 in 0 : vector<8x64xf32>, vector<8x64xf32> -> vector<16x64xf32>
    %cst_8 = arith.constant dense<0.000000e+00> : vector<64x64xf32>
    %13 = tpu.matmul %11, %12, %cst_8 {dimension_numbers = #tpu.dot_dimension_numbers<[0], [0], [1], [1], [0, 1, 1, 1], [], []>} : vector<16x64xf32>, vector<16x64xf32>, vector<64x64xf32> -> vector<64x64xf32>
    %cst_9 = arith.constant dense<0xFF800000> : vector<64xf32>
    %14 = vector.multi_reduction <maximumf>, %13, %cst_9 [0] : vector<64x64xf32> to vector<64xf32>
    %15 = vector.shape_cast %14 : vector<64xf32> to vector<1x64xf32>
    %16 = vector.broadcast %15 : vector<1x64xf32> to vector<64x64xf32>
    %17 = arith.subf %13, %16 : vector<64x64xf32>
    %18 = math.exp %17 : vector<64x64xf32>
    %cst_10 = arith.constant dense<0.000000e+00> : vector<64xf32>
    %19 = vector.multi_reduction <add>, %18, %cst_10 [0] : vector<64x64xf32> to vector<64xf32>
    %20 = vector.shape_cast %19 : vector<64xf32> to vector<1x64xf32>
    %cst_11 = arith.constant dense<0.000000e+00> : vector<8x64xf32>
    %21 = tpu.matmul %9, %18, %cst_11 {dimension_numbers = #tpu.dot_dimension_numbers<[1], [0], [0], [1], [0, 0, 1, 1], [], []>} : vector<8x64xf32>, vector<64x64xf32>, vector<8x64xf32> -> vector<8x64xf32>
    %22 = tpu.reciprocal %20 : vector<1x64xf32> -> vector<1x64xf32>
    %23 = vector.broadcast %22 : vector<1x64xf32> to vector<8x64xf32>
    %24 = arith.mulf %21, %23 : vector<8x64xf32>
    %25 = vector.extract_strided_slice %6 {offsets = [8, 0], sizes = [8, 64], strides = [1, 1]} : vector<96x64xf32> to vector<8x64xf32>
    %26 = vector.extract_strided_slice %6 {offsets = [40, 0], sizes = [8, 64], strides = [1, 1]} : vector<96x64xf32> to vector<8x64xf32>
    %27 = vector.extract_strided_slice %6 {offsets = [72, 0], sizes = [8, 64], strides = [1, 1]} : vector<96x64xf32> to vector<8x64xf32>
    %c8 = arith.constant 8 : index
    %c0_12 = arith.constant 0 : index
    %28 = vector.load %arg4[%c8, %c0_12] : memref<32x64xf32, #tpu.memory_space<vmem>>, vector<8x64xf32>
    %29 = tpu.concatenate %26, %25 in 0 : vector<8x64xf32>, vector<8x64xf32> -> vector<16x64xf32>
    %30 = tpu.concatenate %25, %28 in 0 : vector<8x64xf32>, vector<8x64xf32> -> vector<16x64xf32>
    %cst_13 = arith.constant dense<0.000000e+00> : vector<64x64xf32>
    %31 = tpu.matmul %29, %30, %cst_13 {dimension_numbers = #tpu.dot_dimension_numbers<[0], [0], [1], [1], [0, 1, 1, 1], [], []>} : vector<16x64xf32>, vector<16x64xf32>, vector<64x64xf32> -> vector<64x64xf32>
    %cst_14 = arith.constant dense<0xFF800000> : vector<64xf32>
    %32 = vector.multi_reduction <maximumf>, %31, %cst_14 [0] : vector<64x64xf32> to vector<64xf32>
    %33 = vector.shape_cast %32 : vector<64xf32> to vector<1x64xf32>
    %34 = vector.broadcast %33 : vector<1x64xf32> to vector<64x64xf32>
    %35 = arith.subf %31, %34 : vector<64x64xf32>
    %36 = math.exp %35 : vector<64x64xf32>
    %cst_15 = arith.constant dense<0.000000e+00> : vector<64xf32>
    %37 = vector.multi_reduction <add>, %36, %cst_15 [0] : vector<64x64xf32> to vector<64xf32>
    %38 = vector.shape_cast %37 : vector<64xf32> to vector<1x64xf32>
    %cst_16 = arith.constant dense<0.000000e+00> : vector<8x64xf32>
    %39 = tpu.matmul %27, %36, %cst_16 {dimension_numbers = #tpu.dot_dimension_numbers<[1], [0], [0], [1], [0, 0, 1, 1], [], []>} : vector<8x64xf32>, vector<64x64xf32>, vector<8x64xf32> -> vector<8x64xf32>
    %40 = tpu.reciprocal %38 : vector<1x64xf32> -> vector<1x64xf32>
    %41 = vector.broadcast %40 : vector<1x64xf32> to vector<8x64xf32>
    %42 = arith.mulf %39, %41 : vector<8x64xf32>
    %43 = vector.extract_strided_slice %6 {offsets = [16, 0], sizes = [8, 64], strides = [1, 1]} : vector<96x64xf32> to vector<8x64xf32>
    %44 = vector.extract_strided_slice %6 {offsets = [48, 0], sizes = [8, 64], strides = [1, 1]} : vector<96x64xf32> to vector<8x64xf32>
    %45 = vector.extract_strided_slice %6 {offsets = [80, 0], sizes = [8, 64], strides = [1, 1]} : vector<96x64xf32> to vector<8x64xf32>
    %c16 = arith.constant 16 : index
    %c0_17 = arith.constant 0 : index
    %46 = vector.load %arg4[%c16, %c0_17] : memref<32x64xf32, #tpu.memory_space<vmem>>, vector<8x64xf32>
    %47 = tpu.concatenate %44, %43 in 0 : vector<8x64xf32>, vector<8x64xf32> -> vector<16x64xf32>
    %48 = tpu.concatenate %43, %46 in 0 : vector<8x64xf32>, vector<8x64xf32> -> vector<16x64xf32>
    %cst_18 = arith.constant dense<0.000000e+00> : vector<64x64xf32>
    %49 = tpu.matmul %47, %48, %cst_18 {dimension_numbers = #tpu.dot_dimension_numbers<[0], [0], [1], [1], [0, 1, 1, 1], [], []>} : vector<16x64xf32>, vector<16x64xf32>, vector<64x64xf32> -> vector<64x64xf32>
    %cst_19 = arith.constant dense<0xFF800000> : vector<64xf32>
    %50 = vector.multi_reduction <maximumf>, %49, %cst_19 [0] : vector<64x64xf32> to vector<64xf32>
    %51 = vector.shape_cast %50 : vector<64xf32> to vector<1x64xf32>
    %52 = vector.broadcast %51 : vector<1x64xf32> to vector<64x64xf32>
    %53 = arith.subf %49, %52 : vector<64x64xf32>
    %54 = math.exp %53 : vector<64x64xf32>
    %cst_20 = arith.constant dense<0.000000e+00> : vector<64xf32>
    %55 = vector.multi_reduction <add>, %54, %cst_20 [0] : vector<64x64xf32> to vector<64xf32>
    %56 = vector.shape_cast %55 : vector<64xf32> to vector<1x64xf32>
    %cst_21 = arith.constant dense<0.000000e+00> : vector<8x64xf32>
    %57 = tpu.matmul %45, %54, %cst_21 {dimension_numbers = #tpu.dot_dimension_numbers<[1], [0], [0], [1], [0, 0, 1, 1], [], []>} : vector<8x64xf32>, vector<64x64xf32>, vector<8x64xf32> -> vector<8x64xf32>
    %58 = tpu.reciprocal %56 : vector<1x64xf32> -> vector<1x64xf32>
    %59 = vector.broadcast %58 : vector<1x64xf32> to vector<8x64xf32>
    %60 = arith.mulf %57, %59 : vector<8x64xf32>
    %61 = vector.extract_strided_slice %6 {offsets = [24, 0], sizes = [8, 64], strides = [1, 1]} : vector<96x64xf32> to vector<8x64xf32>
    %62 = vector.extract_strided_slice %6 {offsets = [56, 0], sizes = [8, 64], strides = [1, 1]} : vector<96x64xf32> to vector<8x64xf32>
    %63 = vector.extract_strided_slice %6 {offsets = [88, 0], sizes = [8, 64], strides = [1, 1]} : vector<96x64xf32> to vector<8x64xf32>
    %c24 = arith.constant 24 : index
    %c0_22 = arith.constant 0 : index
    %64 = vector.load %arg4[%c24, %c0_22] : memref<32x64xf32, #tpu.memory_space<vmem>>, vector<8x64xf32>
    %65 = tpu.concatenate %62, %61 in 0 : vector<8x64xf32>, vector<8x64xf32> -> vector<16x64xf32>
    %66 = tpu.concatenate %61, %64 in 0 : vector<8x64xf32>, vector<8x64xf32> -> vector<16x64xf32>
    %cst_23 = arith.constant dense<0.000000e+00> : vector<64x64xf32>
    %67 = tpu.matmul %65, %66, %cst_23 {dimension_numbers = #tpu.dot_dimension_numbers<[0], [0], [1], [1], [0, 1, 1, 1], [], []>} : vector<16x64xf32>, vector<16x64xf32>, vector<64x64xf32> -> vector<64x64xf32>
    %cst_24 = arith.constant dense<0xFF800000> : vector<64xf32>
    %68 = vector.multi_reduction <maximumf>, %67, %cst_24 [0] : vector<64x64xf32> to vector<64xf32>
    %69 = vector.shape_cast %68 : vector<64xf32> to vector<1x64xf32>
    %70 = vector.broadcast %69 : vector<1x64xf32> to vector<64x64xf32>
    %71 = arith.subf %67, %70 : vector<64x64xf32>
    %72 = math.exp %71 : vector<64x64xf32>
    %cst_25 = arith.constant dense<0.000000e+00> : vector<64xf32>
    %73 = vector.multi_reduction <add>, %72, %cst_25 [0] : vector<64x64xf32> to vector<64xf32>
    %74 = vector.shape_cast %73 : vector<64xf32> to vector<1x64xf32>
    %cst_26 = arith.constant dense<0.000000e+00> : vector<8x64xf32>
    %75 = tpu.matmul %63, %72, %cst_26 {dimension_numbers = #tpu.dot_dimension_numbers<[1], [0], [0], [1], [0, 0, 1, 1], [], []>} : vector<8x64xf32>, vector<64x64xf32>, vector<8x64xf32> -> vector<8x64xf32>
    %76 = tpu.reciprocal %74 : vector<1x64xf32> -> vector<1x64xf32>
    %77 = vector.broadcast %76 : vector<1x64xf32> to vector<8x64xf32>
    %78 = arith.mulf %75, %77 : vector<8x64xf32>
    %79 = tpu.concatenate %24, %42, %60, %78 in 0 : vector<8x64xf32>, vector<8x64xf32>, vector<8x64xf32>, vector<8x64xf32> -> vector<32x64xf32>
    %c0_27 = arith.constant 0 : index
    %c0_28 = arith.constant 0 : index
    %c0_29 = arith.constant 0 : index
    %80 = vector.load %arg5[%c0_27, %c0_28, %c0_29] : memref<1x32x64xf32, #tpu.memory_space<vmem>>, vector<1x32x64xf32>
    %81 = vector.shape_cast %80 : vector<1x32x64xf32> to vector<32x64xf32>
    %82 = vector.shape_cast %79 : vector<32x64xf32> to vector<1x32x64xf32>
    tpu.vector_store %arg5[%c0_27, %c0_28, %c0_29], %82 {strides = array<i32>} : memref<1x32x64xf32, #tpu.memory_space<vmem>>, vector<1x32x64xf32>,
    return
  }
  func.func @transform_0(%arg0: i32) -> (i32, i32, i32) {
    %c0_i32 = arith.constant 0 : i32
    %c0_i32_0 = arith.constant 0 : i32
    %c0_i32_1 = arith.constant 0 : i32
    return %arg0, %c0_i32, %c0_i32_0 : i32, i32, i32
  }
  func.func @transform_1(%arg0: i32) -> (i32, i32) {
    %c0_i32 = arith.constant 0 : i32
    %c0_i32_0 = arith.constant 0 : i32
    %c0_i32_1 = arith.constant 0 : i32
    return %c0_i32, %c0_i32_0 : i32, i32
  }
  func.func @transform_2(%arg0: i32) -> (i32, i32) {
    %c0_i32 = arith.constant 0 : i32
    %c0_i32_0 = arith.constant 0 : i32
    %c0_i32_1 = arith.constant 0 : i32
    return %c0_i32, %c0_i32_0 : i32, i32
  }
  func.func @transform_3(%arg0: i32) -> (i32, i32) {
    %c0_i32 = arith.constant 0 : i32
    %c0_i32_0 = arith.constant 0 : i32
    %c0_i32_1 = arith.constant 0 : i32
    return %c0_i32, %c0_i32_0 : i32, i32
  }
  func.func @transform_4(%arg0: i32) -> (i32, i32, i32) {
    %c0_i32 = arith.constant 0 : i32
    %c0_i32_0 = arith.constant 0 : i32
    %c0_i32_1 = arith.constant 0 : i32
    return %arg0, %c0_i32, %c0_i32_0 : i32, i32, i32
  }
}

</mosaic_0001>

<bundles_post_ra>
// kernel: tpu_custom_call.1
= control target key start
LH: loop header
LB: loop body
LE: loop exit
PB: predicated region body
PF: predicated region fallthrough
CT: control target
= control target key end

     0   :  { %9 = vsyncpa [#allocation3], 0  ;;  %s2777_s0 = inlined_call_operand.vmem [shape: f32[2,32,64], index: 0, kind: input, shape index: {}]   ;;  %s2778_s1 = inlined_call_operand.vmem [shape: f32[96,32], index: 1, kind: input, shape index: {}]   ;;  %s2779_s2 = inlined_call_operand.vmem [shape: f32[96,1], index: 2, kind: input, shape index: {}]   ;;  %s2780_s3 = inlined_call_operand.vmem [shape: f32[32,64], index: 3, kind: input, shape index: {}]   ;;  %s2781_s4 = inlined_call_operand.hbm [shape: f32[2,32,64], index: 4, kind: output, shape index: {}]  }
   0x1   :  { %11 = vsyncpa [#allocation3 + $0x1], 0  ;;  %s2347_s15 = smov 0   ;;  %s2349_s16 = smov 0  }
   0x2   :  { %s2351_s17 = smov 0   ;;  %s2353_s18 = smov 0  }
   0x3 LB: > { %s2368_s19 = sadd.s32 4294967295, %s2313_s18   ;;  %s1740_s20 = sadd.s32 4294967294, %s2313_s18   ;;  %s2313_s18 = sphi %s2353_s18, %s2787_s18   ;;  %s2309_s17 = sphi %s2351_s17, %s2786_s17   ;;  %s2305_s16 = sphi %s2349_s16, %s2785_s16   ;;  %s2301_s15 = sphi %s2347_s15, %s2784_s15  }
   0x4   : > { %s2372_s21 = sadd.s32 1, %s2313_s18   ;;  %s113_s22 = sadd.s32 1, %s2309_s17 }
   0x5   : > { %s110_s23 = ssub.s32 %s2313_s18, %s2372_s21  ;;  %p123_p0 = scmp.ne.s32.totalorder %s2309_s17, %s2305_s16 }
   0x6   : > { %p111_p1 = scmp.eq.s32.totalorder %s110_s23, 0  ;;  %p124_p2 = scmp.eq.s32.totalorder %s2368_s19, 1 }
   0x7   : > { %p129_p3 = scmp.ne.s32.totalorder %s2305_s16, %s2301_s15  ;;  %p130_p4 = scmp.eq.s32.totalorder %s1740_s20, 1 }
   0x8   : > { %s2383_s24 = scalar_select %p111_p1, %s2309_s17, %s113_s22  }
   0x9   : > { %p2385_p5 = por %p124_p2, %p123_p0  ;;  %p2389_p6 = por %p130_p4, %p129_p3 }
   0xa   : > { %p1743_p7 = scmp.ge.s32.totalorder %s2313_s18, 1  ;;  %p165_p8 = scmp.lt.s32.totalorder %s2313_s18, 3 }
   0xc   : > { %p166_p9 = pnand %p1743_p7, %p165_p8 }
   0xd   : > { %p191_p10 = scmp.lt.s32.totalorder (!%p166_p9), %s2368_s19, 1  ;;  %v200_v0 = vld [vmem:[%s2778_s1] sm:$0xff] (!%p166_p9)  ;;  %vm284_vm0 = vcmask (!%p166_p9), 261120   ;;  %v2315_v1 = vmov (!%p166_p9), 0   ;;  %v217_v10 = vld [vmem:[%s2779_s2 + $0x28] sm:$0xff] (!%p166_p9)  ;;  %v202_v13 = vld [vmem:[%s2778_s1 + $0x10] sm:$0xff] (!%p166_p9) }
   0xe   : > { %169 = sbr.rel (%p166_p9) target bundleno = 1753 (0x6d9), region = 36  ;;  %1902 = vmatprep.mubr.msk.f32.mxu0 (!%p166_p9), %vm284_vm0, %v200_v0  ;;  %2177 = vset.pattern.permute.xlu0 (!%p166_p9), %v2315_v1  ;;  %v216_v2 = vld [vmem:[%s2779_s2 + $0x20] sm:$0xff] (!%p166_p9)  ;;  %v201_v12 = vld [vmem:[%s2778_s1 + $0x8] sm:$0xff] (!%p166_p9)  ;;  %v203_v14 = vld [vmem:[%s2778_s1 + $0x18] sm:$0xff] (!%p166_p9)  ;;  %vm479_vm1 = vcmask (!%p166_p9), 130048   ;;  %v2316_v59 = vmov (!%p166_p9), 0.0|0.0  }
   0xf   : > { %246 = vperm.xlu0 (!%p166_p9), %2177, %v216_v2   ;;  %v212_v3 = vld [vmem:[%s2779_s2] sm:$0xff] (!%p166_p9)  ;;  %v205_v16 = vld [vmem:[%s2778_s1 + $0x28] sm:$0xff] (!%p166_p9)  ;;  %v206_v17 = vld [vmem:[%s2778_s1 + $0x30] sm:$0xff] (!%p166_p9)  ;;  %vm2317_vm2 = vmmov (!%p166_p9), 0   ;;  %v2318_v60 = vmov (!%p166_p9), 0.0   ;;  %vm609_vm3 = vcmask (!%p166_p9), 523264  }
  0x10   : > { %v220_v11 = vld [vmem:[%s2779_s2 + $0x40] sm:$0xff] (!%p166_p9)  ;;  %v207_v18 = vld [vmem:[%s2778_s1 + $0x38] sm:$0xff] (!%p166_p9)  ;;  %v209_v20 = vld [vmem:[%s2778_s1 + $0x48] sm:$0xff] (!%p166_p9)  ;;  %s188_s5 = sand.u32 (!%p166_p9), 1, %s2305_s16   ;;  %s1801_s20 = sshll.u32 (!%p166_p9), %s2368_s19, 9 }
  0x11   : > { %v204_v15 = vld [vmem:[%s2778_s1 + $0x20] sm:$0xff] (!%p166_p9)  ;;  %v210_v39 = vld [vmem:[%s2778_s1 + $0x50] sm:$0xff] (!%p166_p9)  ;;  %v211_v40 = vld [vmem:[%s2778_s1 + $0x58] sm:$0xff] (!%p166_p9)  ;;  %s2730_s27 = scalar_lea.hbm (!%p166_p9), %s2781_s4, %s1801_s20  ;;  %s2736_s28 = scalar_lea.sflag (!%p166_p9), [#allocation3], %s188_s5 }
  0x12   : > { %v208_v19 = vld [vmem:[%s2778_s1 + $0x40] sm:$0xff] (!%p166_p9)  ;;  %v213_v41 = vld [vmem:[%s2779_s2 + $0x8] sm:$0xff] (!%p166_p9)  ;;  %v214_v42 = vld [vmem:[%s2779_s2 + $0x10] sm:$0xff] (!%p166_p9) }
  0x13   : > { %226 = vperm.xlu0 (!%p166_p9), %2177, %v212_v3   ;;  %v446_v25 = vld [vmem:[%s2780_s3] sm:$0xff] (!%p166_p9)  ;;  %v221_v43 = vld [vmem:[%s2779_s2 + $0x48] sm:$0xff] (!%p166_p9)  ;;  %v218_v54 = vld [vmem:[%s2779_s2 + $0x30] sm:$0xff] (!%p166_p9) }
  0x14   : > { %v219_v55 = vld [vmem:[%s2779_s2 + $0x38] sm:$0xff] (!%p166_p9)  ;;  %v222_v56 = vld [vmem:[%s2779_s2 + $0x50] sm:$0xff] (!%p166_p9) }
  0x15   : > { %s192_s29 = scalar_select %p191_p10, %s2368_s19, 1 }
  0x17   : > { %s1800_s6 = sshll.u32 %s192_s29, 5  ;;  %251 = vperm.xlu0 %2177, %v217_v10   ;;  %s2319_s29 = smov [#allocation2]  }
  0x18   : > { %s195_s9 = scalar_lea.vmem %s2777_s0, %s1800_s6  ;;  %s1744_s6 = sshll.u32 %s188_s5, 5 }
  0x19   : > { %v196_v4 = vld [vmem:[%s195_s9] sm:$0xff]  ;;  %v197_v5 = vld [vmem:[%s195_s9 + $0x8] sm:$0xff]  ;;  %v198_v6 = vld [vmem:[%s195_s9 + $0x10] sm:$0xff]  ;;  %s2255_s30 = sshll.u32 %s2319_s29, 4  ;;  %s2256_s30 = int_to_ptr.vmem [resolvable:$false] %s2255_s30 }
  0x1a   : > { %v2060_v7 = vpack.c.bf16 %v197_v5, %v196_v4  ;;  %v199_v8 = vld [vmem:[%s195_s9 + $0x18] sm:$0xff]  ;;  %s2616_s9 = scalar_lea.vmem [#allocation2], %s1744_s6  ;;  %s2257_s6 = scalar_lea.vmem %s2256_s30, 1024 }
  0x1b   : > { %v2064_v9 = vpack.c.bf16 %v199_v8, %v198_v6  ;;  %266 = vperm.xlu0 %2177, %v220_v11   ;;  %s1678_s14 = sshll.u32 %s2616_s9, 4  ;;  %s2725_s14 = int_to_ptr.vmem [resolvable:$true] %s1678_s14 }
  0x1c   : > { %2061 = vmatprep.subr.bf16.mxu0 %v2060_v7  ;;  %s2251_s19 = scalar_lea.vmem %s2725_s14, 512  ;;  %p2258_p0 = scmp.lt.s32.totalorder %s2725_s14, %s2256_s30 }
  0x1d   : > { %2063 = vmatpush3.bf16.msra.mxu0 %v2060_v7  ;;  %p2252_p11 = scmp.ne.s32.totalorder %s2725_s14, %s2251_s19  ;;  %p2259_p1 = scmp.lt.s32.totalorder %s2257_s6, %s2251_s19 }
  0x1e   : > { %2065 = vmatprep.subr.bf16.mxu0 %v2064_v9 }
  0x1f   : > { %p2253_p12 = pnand %p2252_p11, %p2385_p5  ;;  %p2260_p2 = por %p2259_p1, %p2258_p0 }
  0x21   : > { %2067 = vmatpush3.bf16.msra.mxu0 %v2064_v9  ;;  %p2254_p13 = pneg %p2253_p12 }
  0x22   : > { %2088 = vmatprep.subr.bf16.mxu0 %v2316_v59 }
  0x23   : > { %p2261_p3 = pnand %p2260_p2, %p2254_p13 }
  0x24   : > { %1903 = vmatmul.mubr.msk.f32.vlgmr.msra.gmra.mrb[0].mxu0 %vm284_vm0, %v201_v12 }
  0x25   : > { %1905 = vmatprep.mubr.msk.f32.mxu0 %vm284_vm0, %v202_v13 }
  0x28   : > { %1906 = vmatmul.mubr.msk.f32.gmra.mrb[2].mxu0 %vm284_vm0, %v203_v14 }
  0x29   : > { %1908 = vmatprep.mubr.msk.f32.mxu0 %vm284_vm0, %v204_v15 }
  0x2c   : > { %1909 = vmatmul.mubr.msk.f32.gmra.mrb[4].mxu0 %vm284_vm0, %v205_v16 }
  0x2d   : > { %1911 = vmatprep.mubr.msk.f32.mxu0 %vm284_vm0, %v206_v17 }
  0x30   : > { %1912 = vmatmul.mubr.msk.f32.gmra.mrb[6].mxu0 %vm284_vm0, %v207_v18 }
  0x31   : > { %1914 = vmatprep.mubr.msk.f32.mxu0 %vm284_vm0, %v208_v19 }
  0x34   : > { %1915 = vmatmul.mubr.msk.f32.gmra.mrb[8].mxu0 %vm284_vm0, %v209_v20 }
  0x35   : > { %1917 = vmatprep.mubr.msk.f32.mxu0 %vm284_vm0, %v210_v39 }
  0x38   : > { %1918 = vmatmul.mubr.msk.f32.gmra.mrb[10].mxu0 %vm284_vm0, %v211_v40 }
  0x39   : > { %1987 = vmatprep.mubr.msk.f32.mxu0 %vm2317_vm2, %v2318_v60 }
  0x8e   : > { %v247_v21 = vpop.permute.xlu0 %246 }
  0x92   : > { %v227_v22 = vpop.permute.xlu0 %226 }
  0x96   : > { %v252_v30 = vpop.permute.xlu0 %251 }
  0x9a   : > { %v2516_v61 = vpop.permute.xlu0 %266 }
  0xf7   : > { %v1904_v23 = vpop.f32.mrb[0].mxu0 }
  0xf8   : > { %v387_v24 = vpop.f32.mrb[1].mxu0 }
  0xf9   : > { %v388_v26 = vadd.f32 %v387_v24, %v227_v22 }
  0xfb   : > { %v2456_v27 = vpop.f32.mrb[2].mxu0  ;;  %v2068_v28 = vpack.c.bf16 %v446_v25, %v388_v26 }
  0xfc   : > { %v2458_v29 = vpop.f32.mrb[3].mxu0 }
  0xfd   : > { %2069 = vmatprep.subr.bf16.mxu1 %v2068_v28 }
  0xfe   : > { %2071 = vmatpush3.bf16.msra.mxu1 %v2068_v28 }
  0xff   : > { %v1910_v31 = vpop.f32.mrb[4].mxu0  ;;  %2072 = vmatprep.subr.bf16.mxu1 %v2316_v59 }
 0x100   : > { %v413_v32 = vadd.f32 %v1910_v31, %v252_v30  ;;  %v407_v33 = vpop.f32.mrb[5].mxu0 }
 0x101   : > { %v408_v34 = vadd.f32 %v407_v33, %v247_v21 }
 0x102   : > { %752 = vxpose.xlu0.b32.start [1/2] (short) (narrow) %v413_v32, 64 }
 0x103   : > { %447 = vxpose.xlu1.b32.start [1/2] (short) (narrow) %v408_v34, 64  ;;  %v2460_v35 = vpop.f32.mrb[6].mxu0 }
 0x104   : > { %v2462_v36 = vpop.f32.mrb[7].mxu0 }
 0x107   : > { %v2464_v37 = vpop.f32.mrb[8].mxu0  ;;  %448 = vxpose.xlu1.b32.end [2/2] (short) (narrow) %v388_v26, 64 }
 0x108   : > { %v2466_v38 = vpop.f32.mrb[9].mxu0 }
 0x10b   : > { %v2506_v57 = vpop.f32.mrb[10].mxu0 }
 0x10c   : > { %v2508_v58 = vpop.f32.mrb[11].mxu0 }
 0x125   : > { %2178 = vset.pattern.permute.xlu1 %v2315_v1 }
 0x13d   : > { %231 = vperm.xlu1 %2178, %v213_v41  }
 0x141   : > { %236 = vperm.xlu1 %2178, %v214_v42  }
 0x145   : > { %271 = vperm.xlu1 %2178, %v221_v43  }
 0x183   : > { %v463_v44 = vpop.trf.xlu1 }
 0x184   : > { %1924 = vmatprep.mubr.msk.f32.mxu1 %vm479_vm1, %v463_v44 }
 0x187   : > { %v464_v45 = vpop.trf.xlu1 }
 0x188   : > { %1925 = vmatmul.mubr.msk.f32.vlgmr.msra.gmra.mrb[0].mxu1 %vm479_vm1, %v464_v45 }
 0x18b   : > { %v465_v46 = vpop.trf.xlu1 }
 0x18c   : > { %1927 = vmatprep.mubr.msk.f32.mxu1 %vm479_vm1, %v465_v46 }
 0x18f   : > { %v466_v47 = vpop.trf.xlu1 }
 0x190   : > { %1928 = vmatmul.mubr.msk.f32.gmra.mrb[2].mxu1 %vm479_vm1, %v466_v47 }
 0x193   : > { %v467_v48 = vpop.trf.xlu1 }
 0x194   : > { %1930 = vmatprep.mubr.msk.f32.mxu1 %vm479_vm1, %v467_v48 }
 0x197   : > { %v468_v49 = vpop.trf.xlu1 }
 0x198   : > { %1931 = vmatmul.mubr.msk.f32.gmra.mrb[4].mxu1 %vm479_vm1, %v468_v49 }
 0x19b   : > { %v469_v50 = vpop.trf.xlu1 }
 0x19c   : > { %1933 = vmatprep.mubr.msk.f32.mxu1 %vm479_vm1, %v469_v50 }
 0x19f   : > { %v470_v51 = vpop.trf.xlu1 }
 0x1a0   : > { %1934 = vmatmul.mubr.msk.f32.gmra.mrb[6].mxu1 %vm479_vm1, %v470_v51 }
 0x1a1   : > { %1952 = vmatprep.mubr.msk.f32.mxu1 %vm2317_vm2, %v2318_v60 }
 0x1bc   : > { %v232_v52 = vpop.permute.xlu1 %231 }
 0x1bd   : > { %v2494_v53 = vadd.f32 %v1904_v23, %v232_v52 }
 0x1bf   : > { %753 = vxpose.xlu0.b32.end [2/2] (short) (narrow) %v2494_v53, 64 }
 0x1c0   : > { %v237_v40 = vpop.permute.xlu1 %236 }
 0x1c1   : > { %v2544_v43 = vadd.f32 %v2458_v29, %v237_v40 }
 0x200   : > { %256 = vperm.xlu0 %2177, %v218_v54  }
 0x204   : > { %261 = vperm.xlu0 %2177, %v219_v55  }
 0x208   : > { %276 = vperm.xlu0 %2177, %v222_v56  }
 0x23b   : > { %v2518_v62 = vpop.trf.xlu0 }
 0x23f   : > { %v2520_v63 = vpop.trf.xlu0 }
 0x243   : > { %v2522_v1 = vpop.trf.xlu0 }
 0x247   : > { %v2524_v3 = vpop.trf.xlu0 }
 0x24b   : > { %v2526_v6 = vpop.trf.xlu0 }
 0x24f   : > { %v2532_v14 = vpop.trf.xlu0 }
 0x253   : > { %v2534_v18 = vpop.trf.xlu0 }
 0x257   : > { %v2540_v28 = vpop.trf.xlu0 }
 0x25b   : > { %v1926_v0 = vpop.f32.mrb[0].mxu1 }
 0x25c   : > { %v570_v2 = vpop.f32.mrb[1].mxu1  ;;  %v611_v8 = vsel %vm609_vm3, %v1926_v0, -inf }
 0x25d   : > { %v610_v11 = vsel %vm609_vm3, %v570_v2, -inf }
 0x263   : > { %v1929_v4 = vpop.f32.mrb[2].mxu1 }
 0x264   : > { %v580_v5 = vpop.f32.mrb[3].mxu1  ;;  %v613_v19 = vsel %vm609_vm3, %v1929_v4, -inf }
 0x265   : > { %v612_v22 = vsel %vm609_vm3, %v580_v5, -inf }
 0x26b   : > { %v1932_v7 = vpop.f32.mrb[4].mxu1 }
 0x26c   : > { %v616_v9 = vsel %vm609_vm3, %v1932_v7, -inf  ;;  %v590_v10 = vpop.f32.mrb[5].mxu1 }
 0x26d   : > { %v617_v12 = vmax.f32 %v611_v8, %v616_v9  ;;  %v614_v13 = vsel %vm609_vm3, %v590_v10, -inf }
 0x26e   : > { %v615_v15 = vmax.f32 %v610_v11, %v614_v13 }
 0x270   : > { %v622_v16 = vmax.f32 %v615_v15, %v617_v12 }
 0x273   : > { %v1935_v17 = vpop.f32.mrb[6].mxu1 }
 0x274   : > { %v620_v20 = vsel %vm609_vm3, %v1935_v17, -inf  ;;  %v600_v21 = vpop.f32.mrb[7].mxu1 }
 0x275   : > { %v621_v23 = vmax.f32 %v613_v19, %v620_v20  ;;  %v618_v24 = vsel %vm609_vm3, %v600_v21, -inf }
 0x276   : > { %v619_v25 = vmax.f32 %v612_v22, %v618_v24 }
 0x278   : > { %v623_v26 = vmax.f32 %v619_v25, %v621_v23 }
 0x27a   : > { %v624_v30 = vmax.f32 %v622_v16, %v623_v26 }
 0x27c   : > { %v625_v31 = vrot.slane %v624_v30, 4 }
 0x27e   : > { %v626_v32 = vmax.f32 %v624_v30, %v625_v31 }
 0x27f   : > { %v257_v33 = vpop.permute.xlu0 %256 }
 0x280   : > { %v627_v34 = vrot.slane %v626_v32, 2  ;;  %v418_v39 = vadd.f32 %v2462_v36, %v257_v33 }
 0x282   : > { %v628_v41 = vmax.f32 %v626_v32, %v627_v34  ;;  %1055 = vxpose.xlu1.b32.start [1/2] (short) (narrow) %v418_v39, 64  ;;  %v751_v39 = vld [vmem:[%s2780_s3 + $0x8] sm:$0xff] }
 0x283   : > { %v262_v42 = vpop.permute.xlu0 %261 }
 0x284   : > { %v629_v44 = vrot.slane %v628_v41, 1  ;;  %v423_v45 = vadd.f32 %v2460_v35, %v262_v42 }
 0x286   : > { %v630_v46 = vmax.f32 %v628_v41, %v629_v44  ;;  %1358 = vxpose.xlu0.b32.start [1/2] (short) (narrow) %v423_v45, 64  ;;  %1056 = vxpose.xlu1.b32.end [2/2] (short) (narrow) %v2544_v43, 64  ;;  %v2084_v44 = vpack.c.bf16 %v751_v39, %v2494_v53  ;;  %v2588_v53 = vpop.permute.xlu1 %271 }
 0x288   : > { %v631_v47 = vsub.f32 %v570_v2, %v630_v46  ;;  %v632_v48 = vsub.f32 %v1926_v0, %v630_v46  ;;  %v633_v49 = vsub.f32 %v580_v5, %v630_v46  ;;  %v634_v50 = vsub.f32 %v1929_v4, %v630_v46 }
 0x289   : > { %v635_v51 = vsub.f32 %v590_v10, %v630_v46  ;;  %v636_v36 = vsub.f32 %v1932_v7, %v630_v46  ;;  %v637_v52 = vsub.f32 %v600_v21, %v630_v46  ;;  %v638_v54 = vsub.f32 %v1935_v17, %v630_v46 }
 0x28a   : > { %v639_v55 = vmul.f32 1.442695, %v631_v47  ;;  %v641_v56 = vmul.f32 1.442695, %v632_v48  ;;  %v643_v8 = vmul.f32 1.442695, %v633_v49  ;;  %v428_v46 = vadd.f32 %v2466_v38, %v2516_v61 }
 0x28b   : > { %v645_v29 = vmul.f32 1.442695, %v634_v50  ;;  %v647_v9 = vmul.f32 1.442695, %v635_v51  ;;  %v649_v35 = vmul.f32 1.442695, %v636_v36 }
 0x28c   : > { %2179 = vpow2.f32 %v639_v55  ;;  %v651_v11 = vmul.f32 1.442695, %v637_v52  ;;  %v653_v12 = vmul.f32 1.442695, %v638_v54  ;;  %v215_v38 = vld [vmem:[%s2779_s2 + $0x18] sm:$0xff] }
 0x28d   : > { %2181 = vpow2.f32 %v641_v56  ;;  %v223_v56 = vld [vmem:[%s2779_s2 + $0x58] sm:$0xff] }
 0x28e   : > { %2183 = vpow2.f32 %v643_v8 }
 0x28f   : > { %2185 = vpow2.f32 %v645_v29 }
 0x290   : > { %2187 = vpow2.f32 %v647_v9 }
 0x291   : > { %2189 = vpow2.f32 %v649_v35 }
 0x292   : > { %2191 = vpow2.f32 %v651_v11 }
 0x293   : > { %2193 = vpow2.f32 %v653_v12 }
 0x296   : > { %v2180_v0 = vpop.eup %2179 }
 0x297   : > { %v2182_v2 = vpop.eup %2181  ;;  %v655_v4 = vsel %vm609_vm3, %v2180_v0, 0.0 }
 0x298   : > { %v2184_v5 = vpop.eup %2183  ;;  %v656_v7 = vsel %vm609_vm3, %v2182_v2, 0.0  ;;  %v2073_v10 = vpack.c.bf16 %v2182_v2, %v2180_v0 }
 0x299   : > { %v2186_v13 = vpop.eup %2185  ;;  %v657_v15 = vadd.f32 %v656_v7, %v655_v4  ;;  %v658_v17 = vsel %vm609_vm3, %v2184_v5, 0.0 }
 0x29a   : > { %v2188_v16 = vpop.eup %2187  ;;  %2074 = vmatpush3.bf16.msra.mxu1 %v2073_v10  ;;  %v2076_v19 = vpack.c.bf16 %v2186_v13, %v2184_v5  ;;  %v660_v23 = vsel %vm609_vm3, %v2186_v13, 0.0 }
 0x29b   : > { %v2190_v20 = vpop.eup %2189  ;;  %v659_v21 = vadd.f32 %v658_v17, %v657_v15  ;;  %2075 = vmatprep.subr.bf16.mxu1 %v2316_v59  ;;  %v662_v30 = vsel %vm609_vm3, %v2188_v16, 0.0 }
 0x29c   : > { %v2192_v22 = vpop.eup %2191  ;;  %v2079_v24 = vpack.c.bf16 %v2190_v20, %v2188_v16  ;;  %v664_v33 = vsel %vm609_vm3, %v2190_v20, 0.0 }
 0x29d   : > { %v2194_v25 = vpop.eup %2193  ;;  %v661_v26 = vadd.f32 %v660_v23, %v659_v21  ;;  %v666_v40 = vsel %vm609_vm3, %v2192_v22, 0.0 }
 0x29e   : > { %2077 = vmatpush3.bf16.msra.mxu1 %v2076_v19  ;;  %v2082_v31 = vpack.c.bf16 %v2194_v25, %v2192_v22  ;;  %v668_v42 = vsel %vm609_vm3, %v2194_v25, 0.0 }
 0x29f   : > { %v663_v32 = vadd.f32 %v662_v30, %v661_v26  ;;  %2078 = vmatprep.subr.bf16.mxu1 %v2316_v59 }
 0x2a1   : > { %v665_v34 = vadd.f32 %v664_v33, %v663_v32 }
 0x2a2   : > { %2080 = vmatpush3.bf16.msra.mxu1 %v2079_v24 }
 0x2a3   : > { %v667_v41 = vadd.f32 %v666_v40, %v665_v34  ;;  %2081 = vmatprep.subr.bf16.mxu1 %v2316_v59 }
 0x2a5   : > { %v669_v45 = vadd.f32 %v668_v42, %v667_v41 }
 0x2a6   : > { %2083 = vmatpush3.bf16.msra.mxu1 %v2082_v31 }
 0x2a7   : > { %2085 = vmatprep.subr.bf16.mxu1 %v2084_v44  ;;  %v670_v48 = vrot.slane %v669_v45, 4 }
 0x2a9   : > { %1953 = vmatmul.mubr.msk.f32.vlgmr.msra.gmra.mrb[8].mxu1 %vm609_vm3, %v428_v46  ;;  %v671_v49 = vadd.f32 %v670_v48, %v669_v45 }
 0x2aa   : > { %2087 = vmatpush3.bf16.msra.mxu1 %v2084_v44  ;;  %1959 = vmatprep.mubr.msk.f32.mxu1 %vm479_vm1, %v2518_v62 }
 0x2ab   : > { %2104 = vmatprep.subr.bf16.mxu1 %v2316_v59  ;;  %v672_v50 = vrot.slane %v671_v49, 2 }
 0x2ad   : > { %1960 = vmatmul.mubr.msk.f32.vlgmr.msra.gmra.mrb[10].mxu1 %vm479_vm1, %v2520_v63  ;;  %v673_v51 = vadd.f32 %v672_v50, %v671_v49 }
 0x2ae   : > { %1962 = vmatprep.mubr.msk.f32.mxu1 %vm479_vm1, %v2522_v1 }
 0x2af   : > { %v674_v36 = vrot.slane %v673_v51, 1 }
 0x2b1   : > { %1963 = vmatmul.mubr.msk.f32.gmra.mrb[12].mxu1 %vm479_vm1, %v2524_v3  ;;  %v675_v52 = vadd.f32 %v674_v36, %v673_v51 }
 0x2b2   : > { %1965 = vmatprep.mubr.msk.f32.mxu1 %vm479_vm1, %v2526_v6 }
 0x2b3   : > { %2195 = vrcp.f32 %v675_v52 }
 0x2b5   : > { %1966 = vmatmul.mubr.msk.f32.gmra.mrb[14].mxu1 %vm479_vm1, %v2532_v14 }
 0x2b6   : > { %1968 = vmatprep.mubr.msk.f32.mxu1 %vm479_vm1, %v2534_v18 }
 0x2b9   : > { %1969 = vmatmul.mubr.msk.f32.gmra.mrb[16].mxu1 %vm479_vm1, %v2540_v28 }
 0x2ba   : > { %2022 = vmatprep.mubr.msk.f32.mxu1 %vm2317_vm2, %v2318_v60 }
 0x2bc   : > { %241 = vperm.xlu1 %2178, %v215_v38  }
 0x2bd   : > { %v2196_v54 = vpop.eup %2195 }
 0x302   : > { %v2590_v61 = vpop.trf.xlu1 }
 0x306   : > { %v2592_v62 = vpop.trf.xlu1 }
 0x30a   : > { %v2594_v63 = vpop.trf.xlu1 }
 0x30e   : > { %v2596_v1 = vpop.trf.xlu1 }
 0x312   : > { %v2598_v3 = vpop.trf.xlu1 }
 0x316   : > { %v2600_v6 = vpop.trf.xlu1 }
 0x31a   : > { %v2602_v14 = vpop.trf.xlu1 }
 0x31e   : > { %v2604_v18 = vpop.trf.xlu1 }
 0x33b   : > { %v242_v28 = vpop.permute.xlu1 %241 }
 0x33c   : > { %v2607_v47 = vadd.f32 %v2456_v27, %v242_v28 }
 0x33e   : > { %1359 = vxpose.xlu0.b32.end [2/2] (short) (narrow) %v2607_v47, 64 }
 0x37c   : > { %v745_v55 = vpop.f32.mrb[8].mxu1 }
 0x37d   : > { %v750_v27 = vmul.f32 %v2196_v54, %v745_v55  ;;  %v1954_v8 = vpop.f32.mrb[9].mxu1 }
 0x37f   : > { %1660 = vst.msk [vmem:[%s2616_s9] sm:$0xff] %vm609_vm3, %v750_v27  ;;  %281 = vperm.xlu0 %2177, %v223_v56  }
 0x380   : > { %v1961_v29 = vpop.f32.mrb[10].mxu1 }
 0x381   : > { %v874_v9 = vpop.f32.mrb[11].mxu1  ;;  %v914_v0 = vsel %vm609_vm3, %v1961_v29, -inf }
 0x382   : > { %v913_v5 = vsel %vm609_vm3, %v874_v9, -inf }
 0x384   : > { %v1964_v35 = vpop.f32.mrb[12].mxu1 }
 0x385   : > { %v884_v11 = vpop.f32.mrb[13].mxu1  ;;  %v916_v16 = vsel %vm609_vm3, %v1964_v35, -inf }
 0x386   : > { %v915_v21 = vsel %vm609_vm3, %v884_v11, -inf }
 0x388   : > { %v1967_v12 = vpop.f32.mrb[14].mxu1 }
 0x389   : > { %v919_v2 = vsel %vm609_vm3, %v1967_v12, -inf  ;;  %v894_v4 = vpop.f32.mrb[15].mxu1 }
 0x38a   : > { %v920_v7 = vmax.f32 %v914_v0, %v919_v2  ;;  %v917_v10 = vsel %vm609_vm3, %v894_v4, -inf }
 0x38b   : > { %v918_v13 = vmax.f32 %v913_v5, %v917_v10 }
 0x38c   : > { %v1970_v15 = vpop.f32.mrb[16].mxu1 }
 0x38d   : > { %v925_v17 = vmax.f32 %v918_v13, %v920_v7  ;;  %v923_v19 = vsel %vm609_vm3, %v1970_v15, -inf  ;;  %v904_v20 = vpop.f32.mrb[17].mxu1 }
 0x38e   : > { %v924_v22 = vmax.f32 %v916_v16, %v923_v19  ;;  %v921_v23 = vsel %vm609_vm3, %v904_v20, -inf }
 0x38f   : > { %v922_v24 = vmax.f32 %v915_v21, %v921_v23 }
 0x391   : > { %v926_v25 = vmax.f32 %v922_v24, %v924_v22  ;;  %v1054_v24 = vld [vmem:[%s2780_s3 + $0x10] sm:$0xff] }
 0x393   : > { %v927_v26 = vmax.f32 %v925_v17, %v926_v25 }
 0x395   : > { %v928_v30 = vrot.slane %v927_v26, 4 }
 0x397   : > { %v929_v31 = vmax.f32 %v927_v26, %v928_v30 }
 0x399   : > { %v930_v32 = vrot.slane %v929_v31, 2 }
 0x39b   : > { %v931_v33 = vmax.f32 %v929_v31, %v930_v32  ;;  %v2100_v31 = vpack.c.bf16 %v1054_v24, %v2544_v43 }
 0x39d   : > { %v932_v34 = vrot.slane %v931_v33, 1 }
 0x39f   : > { %v933_v39 = vmax.f32 %v931_v33, %v932_v34  ;;  %v433_v33 = vadd.f32 %v2464_v37, %v2588_v53 }
 0x3a1   : > { %v934_v40 = vsub.f32 %v874_v9, %v933_v39  ;;  %v935_v41 = vsub.f32 %v1961_v29, %v933_v39  ;;  %v936_v42 = vsub.f32 %v884_v11, %v933_v39  ;;  %v937_v44 = vsub.f32 %v1964_v35, %v933_v39 }
 0x3a2   : > { %v938_v45 = vsub.f32 %v894_v4, %v933_v39  ;;  %v939_v46 = vsub.f32 %v1967_v12, %v933_v39  ;;  %v940_v38 = vsub.f32 %v904_v20, %v933_v39  ;;  %v941_v28 = vsub.f32 %v1970_v15, %v933_v39 }
 0x3a3   : > { %v942_v48 = vmul.f32 1.442695, %v934_v40  ;;  %v944_v49 = vmul.f32 1.442695, %v935_v41  ;;  %v946_v50 = vmul.f32 1.442695, %v936_v42 }
 0x3a4   : > { %v948_v51 = vmul.f32 1.442695, %v937_v44  ;;  %v950_v36 = vmul.f32 1.442695, %v938_v45  ;;  %v952_v52 = vmul.f32 1.442695, %v939_v46 }
 0x3a5   : > { %2197 = vpow2.f32 %v942_v48  ;;  %v954_v54 = vmul.f32 1.442695, %v940_v38  ;;  %v956_v55 = vmul.f32 1.442695, %v941_v28 }
 0x3a6   : > { %2199 = vpow2.f32 %v944_v49 }
 0x3a7   : > { %2201 = vpow2.f32 %v946_v50 }
 0x3a8   : > { %2203 = vpow2.f32 %v948_v51 }
 0x3a9   : > { %2205 = vpow2.f32 %v950_v36 }
 0x3aa   : > { %2207 = vpow2.f32 %v952_v52 }
 0x3ab   : > { %2209 = vpow2.f32 %v954_v54 }
 0x3ac   : > { %2211 = vpow2.f32 %v956_v55 }
 0x3af   : > { %v2198_v56 = vpop.eup %2197 }
 0x3b0   : > { %v2200_v27 = vpop.eup %2199  ;;  %v958_v8 = vsel %vm609_vm3, %v2198_v56, 0.0 }
 0x3b1   : > { %v2202_v29 = vpop.eup %2201  ;;  %v959_v9 = vsel %vm609_vm3, %v2200_v27, 0.0  ;;  %v2089_v35 = vpack.c.bf16 %v2200_v27, %v2198_v56 }
 0x3b2   : > { %v2204_v11 = vpop.eup %2203  ;;  %v960_v12 = vadd.f32 %v959_v9, %v958_v8  ;;  %v961_v2 = vsel %vm609_vm3, %v2202_v29, 0.0 }
 0x3b3   : > { %v2206_v0 = vpop.eup %2205  ;;  %2090 = vmatpush3.bf16.msra.mxu0 %v2089_v35  ;;  %v2092_v4 = vpack.c.bf16 %v2204_v11, %v2202_v29  ;;  %v963_v13 = vsel %vm609_vm3, %v2204_v11, 0.0 }
 0x3b4   : > { %v2208_v5 = vpop.eup %2207  ;;  %v962_v7 = vadd.f32 %v961_v2, %v960_v12  ;;  %2091 = vmatprep.subr.bf16.mxu0 %v2316_v59  ;;  %v965_v19 = vsel %vm609_vm3, %v2206_v0, 0.0 }
 0x3b5   : > { %v2210_v10 = vpop.eup %2209  ;;  %v2095_v15 = vpack.c.bf16 %v2208_v5, %v2206_v0  ;;  %v967_v22 = vsel %vm609_vm3, %v2208_v5, 0.0 }
 0x3b6   : > { %v2212_v16 = vpop.eup %2211  ;;  %v964_v17 = vadd.f32 %v963_v13, %v962_v7  ;;  %v969_v25 = vsel %vm609_vm3, %v2210_v10, 0.0 }
 0x3b7   : > { %2093 = vmatpush3.bf16.msra.mxu0 %v2092_v4  ;;  %v2098_v20 = vpack.c.bf16 %v2212_v16, %v2210_v10  ;;  %v971_v30 = vsel %vm609_vm3, %v2212_v16, 0.0 }
 0x3b8   : > { %v966_v21 = vadd.f32 %v965_v19, %v964_v17  ;;  %2094 = vmatprep.subr.bf16.mxu0 %v2316_v59  ;;  %v277_v17 = vpop.permute.xlu0 %276 }
 0x3ba   : > { %v968_v23 = vadd.f32 %v967_v22, %v966_v21 }
 0x3bb   : > { %2096 = vmatpush3.bf16.msra.mxu0 %v2095_v15 }
 0x3bc   : > { %v970_v26 = vadd.f32 %v969_v25, %v968_v23  ;;  %2097 = vmatprep.subr.bf16.mxu0 %v2316_v59  ;;  %v1374_v25 = vpop.trf.xlu0 }
 0x3be   : > { %v972_v32 = vadd.f32 %v971_v30, %v970_v26 }
 0x3bf   : > { %2099 = vmatpush3.bf16.msra.mxu0 %v2098_v20 }
 0x3c0   : > { %2101 = vmatprep.subr.bf16.mxu0 %v2100_v31  ;;  %v973_v37 = vrot.slane %v972_v32, 4 }
 0x3c2   : > { %1988 = vmatmul.mubr.msk.f32.vlgmr.msra.gmra.mrb[12].mxu0 %vm609_vm3, %v433_v33  ;;  %v974_v43 = vadd.f32 %v973_v37, %v972_v32 }
 0x3c3   : > { %2103 = vmatpush3.bf16.msra.mxu0 %v2100_v31  ;;  %1994 = vmatprep.mubr.msk.f32.mxu0 %vm479_vm1, %v2590_v61  ;;  %v1375_v31 = vpop.trf.xlu0 }
 0x3c4   : > { %2120 = vmatprep.subr.bf16.mxu0 %v2316_v59  ;;  %v975_v53 = vrot.slane %v974_v43, 2 }
 0x3c6   : > { %1995 = vmatmul.mubr.msk.f32.vlgmr.msra.gmra.mrb[14].mxu0 %vm479_vm1, %v2592_v62  ;;  %v976_v61 = vadd.f32 %v975_v53, %v974_v43 }
 0x3c7   : > { %1997 = vmatprep.mubr.msk.f32.mxu0 %vm479_vm1, %v2594_v63 }
 0x3c8   : > { %v977_v62 = vrot.slane %v976_v61, 1 }
 0x3ca   : > { %1998 = vmatmul.mubr.msk.f32.gmra.mrb[16].mxu0 %vm479_vm1, %v2596_v1  ;;  %v978_v63 = vadd.f32 %v977_v62, %v976_v61 }
 0x3cb   : > { %2000 = vmatprep.mubr.msk.f32.mxu0 %vm479_vm1, %v2598_v3 }
 0x3cc   : > { %2213 = vrcp.f32 %v978_v63 }
 0x3ce   : > { %2001 = vmatmul.mubr.msk.f32.gmra.mrb[18].mxu0 %vm479_vm1, %v2600_v6 }
 0x3cf   : > { %2003 = vmatprep.mubr.msk.f32.mxu0 %vm479_vm1, %v2602_v14 }
 0x3d2   : > { %2004 = vmatmul.mubr.msk.f32.gmra.mrb[20].mxu0 %vm479_vm1, %v2604_v18 }
 0x3d3   : > { %2057 = vmatprep.mubr.msk.f32.mxu0 %vm2317_vm2, %v2318_v60 }
 0x3d6   : > { %v2214_v1 = vpop.eup %2213 }
 0x495   : > { %v1048_v3 = vpop.f32.mrb[12].mxu0 }
 0x496   : > { %v1053_v34 = vmul.f32 %v2214_v1, %v1048_v3  ;;  %v1989_v6 = vpop.f32.mrb[13].mxu0  ;;  %v1376_v3 = vpop.trf.xlu0 }
 0x498   : > { %1661 = vst.msk [vmem:[%s2616_s9 + $0x8] sm:$0xff] %vm609_vm3, %v1053_v34 }
 0x499   : > { %v1996_v14 = vpop.f32.mrb[14].mxu0 }
 0x49a   : > { %v1177_v39 = vpop.f32.mrb[15].mxu0  ;;  %v1217_v60 = vsel %vm609_vm3, %v1996_v14, -inf }
 0x49b   : > { %v1216_v45 = vsel %vm609_vm3, %v1177_v39, -inf }
 0x49d   : > { %v1999_v40 = vpop.f32.mrb[16].mxu0 }
 0x49e   : > { %v1187_v18 = vpop.f32.mrb[17].mxu0  ;;  %v1219_v49 = vsel %vm609_vm3, %v1999_v40, -inf }
 0x49f   : > { %v1218_v52 = vsel %vm609_vm3, %v1187_v18, -inf }
 0x4a1   : > { %v2002_v41 = vpop.f32.mrb[18].mxu0 }
 0x4a2   : > { %v1222_v42 = vsel %vm609_vm3, %v2002_v41, -inf  ;;  %v1197_v44 = vpop.f32.mrb[19].mxu0 }
 0x4a3   : > { %v1223_v46 = vmax.f32 %v1217_v60, %v1222_v42  ;;  %v1220_v38 = vsel %vm609_vm3, %v1197_v44, -inf }
 0x4a4   : > { %v1221_v28 = vmax.f32 %v1216_v45, %v1220_v38  ;;  %v1377_v38 = vpop.trf.xlu0 }
 0x4a5   : > { %v2005_v48 = vpop.f32.mrb[20].mxu0 }
 0x4a6   : > { %v1228_v50 = vmax.f32 %v1221_v28, %v1223_v46  ;;  %v1226_v51 = vsel %vm609_vm3, %v2005_v48, -inf  ;;  %v1207_v36 = vpop.f32.mrb[21].mxu0 }
 0x4a7   : > { %v1227_v54 = vmax.f32 %v1219_v49, %v1226_v51  ;;  %v1224_v55 = vsel %vm609_vm3, %v1207_v36, -inf  ;;  %v1357_v49 = vld [vmem:[%s2780_s3 + $0x18] sm:$0xff] }
 0x4a8   : > { %v1225_v56 = vmax.f32 %v1218_v52, %v1224_v55  ;;  %v2116_v52 = vpack.c.bf16 %v1357_v49, %v2607_v47  ;;  %v1378_v55 = vpop.trf.xlu0 }
 0x4aa   : > { %v1229_v27 = vmax.f32 %v1225_v56, %v1227_v54  ;;  %v438_v56 = vadd.f32 %v2508_v58, %v277_v17 }
 0x4ac   : > { %v1230_v8 = vmax.f32 %v1228_v50, %v1229_v27  ;;  %v1379_v27 = vpop.trf.xlu0 }
 0x4ae   : > { %v1231_v29 = vrot.slane %v1230_v8, 4 }
 0x4b0   : > { %v1232_v9 = vmax.f32 %v1230_v8, %v1231_v29  ;;  %v1380_v8 = vpop.trf.xlu0 }
 0x4b2   : > { %v1233_v35 = vrot.slane %v1232_v9, 2 }
 0x4b4   : > { %v1234_v11 = vmax.f32 %v1232_v9, %v1233_v35  ;;  %v1381_v58 = vpop.trf.xlu0 }
 0x4b6   : > { %v1235_v12 = vrot.slane %v1234_v11, 1 }
 0x4b8   : > { %v1236_v0 = vmax.f32 %v1234_v11, %v1235_v12 }
 0x4ba   : > { %v1237_v2 = vsub.f32 %v1177_v39, %v1236_v0  ;;  %v1238_v4 = vsub.f32 %v1996_v14, %v1236_v0  ;;  %v1239_v5 = vsub.f32 %v1187_v18, %v1236_v0  ;;  %v1240_v7 = vsub.f32 %v1999_v40, %v1236_v0 }
 0x4bb   : > { %v1241_v10 = vsub.f32 %v1197_v44, %v1236_v0  ;;  %v1242_v13 = vsub.f32 %v2002_v41, %v1236_v0  ;;  %v1243_v15 = vsub.f32 %v1207_v36, %v1236_v0  ;;  %v1244_v16 = vsub.f32 %v2005_v48, %v1236_v0 }
 0x4bc   : > { %v1245_v19 = vmul.f32 1.442695, %v1237_v2  ;;  %v1247_v20 = vmul.f32 1.442695, %v1238_v4  ;;  %v1249_v21 = vmul.f32 1.442695, %v1239_v5 }
 0x4bd   : > { %v1251_v22 = vmul.f32 1.442695, %v1240_v7  ;;  %v1253_v23 = vmul.f32 1.442695, %v1241_v10  ;;  %v1255_v24 = vmul.f32 1.442695, %v1242_v13 }
 0x4be   : > { %2215 = vpow2.f32 %v1245_v19  ;;  %v1257_v26 = vmul.f32 1.442695, %v1243_v15  ;;  %v1259_v30 = vmul.f32 1.442695, %v1244_v16 }
 0x4bf   : > { %2217 = vpow2.f32 %v1247_v20 }
 0x4c0   : > { %2219 = vpow2.f32 %v1249_v21 }
 0x4c1   : > { %2221 = vpow2.f32 %v1251_v22 }
 0x4c2   : > { %2223 = vpow2.f32 %v1253_v23 }
 0x4c3   : > { %2225 = vpow2.f32 %v1255_v24 }
 0x4c4   : > { %2227 = vpow2.f32 %v1257_v26 }
 0x4c5   : > { %2229 = vpow2.f32 %v1259_v30 }
 0x4c8   : > { %v2216_v32 = vpop.eup %2215 }
 0x4c9   : > { %v2218_v33 = vpop.eup %2217  ;;  %v1261_v37 = vsel %vm609_vm3, %v2216_v32, 0.0 }
 0x4ca   : > { %v2220_v43 = vpop.eup %2219  ;;  %v1262_v53 = vsel %vm609_vm3, %v2218_v33, 0.0  ;;  %v2105_v61 = vpack.c.bf16 %v2218_v33, %v2216_v32 }
 0x4cb   : > { %v2222_v62 = vpop.eup %2221  ;;  %v1263_v63 = vadd.f32 %v1262_v53, %v1261_v37  ;;  %v1264_v34 = vsel %vm609_vm3, %v2220_v43, 0.0 }
 0x4cc   : > { %v2224_v1 = vpop.eup %2223  ;;  %2106 = vmatpush3.bf16.msra.mxu1 %v2105_v61  ;;  %v2108_v6 = vpack.c.bf16 %v2222_v62, %v2220_v43  ;;  %v1266_v18 = vsel %vm609_vm3, %v2222_v62, 0.0 }
 0x4cd   : > { %v2226_v14 = vpop.eup %2225  ;;  %v1265_v39 = vadd.f32 %v1264_v34, %v1263_v63  ;;  %2107 = vmatprep.subr.bf16.mxu1 %v2316_v59  ;;  %v1268_v44 = vsel %vm609_vm3, %v2224_v1, 0.0 }
 0x4ce   : > { %v2228_v40 = vpop.eup %2227  ;;  %v2111_v41 = vpack.c.bf16 %v2226_v14, %v2224_v1  ;;  %v1270_v28 = vsel %vm609_vm3, %v2226_v14, 0.0 }
 0x4cf   : > { %v2230_v60 = vpop.eup %2229  ;;  %v1267_v42 = vadd.f32 %v1266_v18, %v1265_v39  ;;  %v1272_v50 = vsel %vm609_vm3, %v2228_v40, 0.0 }
 0x4d0   : > { %2109 = vmatpush3.bf16.msra.mxu1 %v2108_v6  ;;  %v2114_v45 = vpack.c.bf16 %v2230_v60, %v2228_v40  ;;  %v1274_v36 = vsel %vm609_vm3, %v2230_v60, 0.0 }
 0x4d1   : > { %v1269_v46 = vadd.f32 %v1268_v44, %v1267_v42  ;;  %2110 = vmatprep.subr.bf16.mxu1 %v2316_v59 }
 0x4d3   : > { %v1271_v48 = vadd.f32 %v1270_v28, %v1269_v46 }
 0x4d4   : > { %2112 = vmatpush3.bf16.msra.mxu1 %v2111_v41 }
 0x4d5   : > { %v1273_v51 = vadd.f32 %v1272_v50, %v1271_v48  ;;  %2113 = vmatprep.subr.bf16.mxu1 %v2316_v59 }
 0x4d7   : > { %v1275_v54 = vadd.f32 %v1274_v36, %v1273_v51 }
 0x4d8   : > { %2115 = vmatpush3.bf16.msra.mxu1 %v2114_v45 }
 0x4d9   : > { %2117 = vmatprep.subr.bf16.mxu1 %v2116_v52  ;;  %v1276_v47 = vrot.slane %v1275_v54, 4 }
 0x4db   : > { %2023 = vmatmul.mubr.msk.f32.vlgmr.msra.gmra.mrb[18].mxu1 %vm609_vm3, %v438_v56  ;;  %v1277_v29 = vadd.f32 %v1276_v47, %v1275_v54 }
 0x4dc   : > { %2119 = vmatpush3.bf16.msra.mxu1 %v2116_v52  ;;  %2029 = vmatprep.mubr.msk.f32.mxu1 %vm479_vm1, %v1374_v25 }
 0x4dd   : > { %v1278_v9 = vrot.slane %v1277_v29, 2 }
 0x4df   : > { %2030 = vmatmul.mubr.msk.f32.vlgmr.msra.gmra.mrb[20].mxu1 %vm479_vm1, %v1375_v31  ;;  %v1279_v35 = vadd.f32 %v1278_v9, %v1277_v29 }
 0x4e0   : > { %2032 = vmatprep.mubr.msk.f32.mxu1 %vm479_vm1, %v1376_v3 }
 0x4e1   : > { %v1280_v11 = vrot.slane %v1279_v35, 1 }
 0x4e3   : > { %2033 = vmatmul.mubr.msk.f32.gmra.mrb[22].mxu1 %vm479_vm1, %v1377_v38  ;;  %v1281_v12 = vadd.f32 %v1280_v11, %v1279_v35 }
 0x4e4   : > { %2035 = vmatprep.mubr.msk.f32.mxu1 %vm479_vm1, %v1378_v55 }
 0x4e5   : > { %2231 = vrcp.f32 %v1281_v12 }
 0x4e7   : > { %2036 = vmatmul.mubr.msk.f32.gmra.mrb[24].mxu1 %vm479_vm1, %v1379_v27 }
 0x4e8   : > { %2038 = vmatprep.mubr.msk.f32.mxu1 %vm479_vm1, %v1380_v8 }
 0x4eb   : > { %2039 = vmatmul.mubr.msk.f32.gmra.mrb[26].mxu1 %vm479_vm1, %v1381_v58 }
 0x4ef   : > { %v2232_v0 = vpop.eup %2231 }
 0x5ae   : > { %v1351_v2 = vpop.f32.mrb[18].mxu1 }
 0x5af   : > { %v1356_v4 = vmul.f32 %v2232_v0, %v1351_v2  ;;  %v2024_v5 = vpop.f32.mrb[19].mxu1 }
 0x5b1   : > { %1662 = vst.msk [vmem:[%s2616_s9 + $0x10] sm:$0xff] %vm609_vm3, %v1356_v4 }
 0x5b2   : > { %v2031_v7 = vpop.f32.mrb[20].mxu1 }
 0x5b3   : > { %v1480_v10 = vpop.f32.mrb[21].mxu1  ;;  %v1520_v17 = vsel %vm609_vm3, %v2031_v7, -inf }
 0x5b4   : > { %v1519_v21 = vsel %vm609_vm3, %v1480_v10, -inf }
 0x5b6   : > { %v2034_v13 = vpop.f32.mrb[22].mxu1 }
 0x5b7   : > { %v1490_v15 = vpop.f32.mrb[23].mxu1  ;;  %v1522_v26 = vsel %vm609_vm3, %v2034_v13, -inf }
 0x5b8   : > { %v1521_v33 = vsel %vm609_vm3, %v1490_v15, -inf }
 0x5ba   : > { %v2037_v16 = vpop.f32.mrb[24].mxu1 }
 0x5bb   : > { %v1525_v19 = vsel %vm609_vm3, %v2037_v16, -inf  ;;  %v1500_v20 = vpop.f32.mrb[25].mxu1 }
 0x5bc   : > { %v1526_v22 = vmax.f32 %v1520_v17, %v1525_v19  ;;  %v1523_v23 = vsel %vm609_vm3, %v1500_v20, -inf }
 0x5bd   : > { %v1524_v24 = vmax.f32 %v1519_v21, %v1523_v23  ;;  %v282_v21 = vpop.permute.xlu0 %281 }
 0x5be   : > { %v2040_v25 = vpop.f32.mrb[26].mxu1 }
 0x5bf   : > { %v1531_v30 = vmax.f32 %v1524_v24, %v1526_v22  ;;  %v1529_v31 = vsel %vm609_vm3, %v2040_v25, -inf  ;;  %v1510_v32 = vpop.f32.mrb[27].mxu1  ;;  %v443_v24 = vadd.f32 %v2506_v57, %v282_v21 }
 0x5c0   : > { %v1530_v37 = vmax.f32 %v1522_v26, %v1529_v31  ;;  %v1527_v43 = vsel %vm609_vm3, %v1510_v32, -inf }
 0x5c1   : > { %v1528_v53 = vmax.f32 %v1521_v33, %v1527_v43 }
 0x5c3   : > { %v1532_v61 = vmax.f32 %v1528_v53, %v1530_v37 }
 0x5c5   : > { %v1533_v62 = vmax.f32 %v1531_v30, %v1532_v61 }
 0x5c7   : > { %v1534_v63 = vrot.slane %v1533_v62, 4 }
 0x5c9   : > { %v1535_v1 = vmax.f32 %v1533_v62, %v1534_v63 }
 0x5cb   : > { %v1536_v3 = vrot.slane %v1535_v1, 2 }
 0x5cd   : > { %v1537_v34 = vmax.f32 %v1535_v1, %v1536_v3 }
 0x5cf   : > { %v1538_v6 = vrot.slane %v1537_v34, 1 }
 0x5d1   : > { %v1539_v14 = vmax.f32 %v1537_v34, %v1538_v6 }
 0x5d3   : > { %v1540_v39 = vsub.f32 %v1480_v10, %v1539_v14  ;;  %v1541_v40 = vsub.f32 %v2031_v7, %v1539_v14  ;;  %v1542_v18 = vsub.f32 %v1490_v15, %v1539_v14  ;;  %v1543_v41 = vsub.f32 %v2034_v13, %v1539_v14 }
 0x5d4   : > { %v1544_v60 = vsub.f32 %v1500_v20, %v1539_v14  ;;  %v1545_v42 = vsub.f32 %v2037_v16, %v1539_v14  ;;  %v1546_v44 = vsub.f32 %v1510_v32, %v1539_v14  ;;  %v1547_v45 = vsub.f32 %v2040_v25, %v1539_v14 }
 0x5d5   : > { %v1548_v46 = vmul.f32 1.442695, %v1540_v39  ;;  %v1550_v38 = vmul.f32 1.442695, %v1541_v40  ;;  %v1552_v28 = vmul.f32 1.442695, %v1542_v18 }
 0x5d6   : > { %v1554_v48 = vmul.f32 1.442695, %v1543_v41  ;;  %v1556_v49 = vmul.f32 1.442695, %v1544_v60  ;;  %v1558_v50 = vmul.f32 1.442695, %v1545_v42 }
 0x5d7   : > { %2233 = vpow2.f32 %v1548_v46  ;;  %v1560_v51 = vmul.f32 1.442695, %v1546_v44  ;;  %v1562_v36 = vmul.f32 1.442695, %v1547_v45 }
 0x5d8   : > { %2235 = vpow2.f32 %v1550_v38 }
 0x5d9   : > { %2237 = vpow2.f32 %v1552_v28 }
 0x5da   : > { %2239 = vpow2.f32 %v1554_v48 }
 0x5db   : > { %2241 = vpow2.f32 %v1556_v49 }
 0x5dc   : > { %2243 = vpow2.f32 %v1558_v50 }
 0x5dd   : > { %2245 = vpow2.f32 %v1560_v51 }
 0x5de   : > { %2247 = vpow2.f32 %v1562_v36 }
 0x5e1   : > { %v2234_v52 = vpop.eup %2233 }
 0x5e2   : > { %v2236_v54 = vpop.eup %2235  ;;  %v1564_v55 = vsel %vm609_vm3, %v2234_v52, 0.0 }
 0x5e3   : > { %v2238_v56 = vpop.eup %2237  ;;  %v1565_v27 = vsel %vm609_vm3, %v2236_v54, 0.0  ;;  %v2121_v8 = vpack.c.bf16 %v2236_v54, %v2234_v52 }
 0x5e4   : > { %v2240_v58 = vpop.eup %2239  ;;  %v1566_v47 = vadd.f32 %v1565_v27, %v1564_v55  ;;  %v1567_v9 = vsel %vm609_vm3, %v2238_v56, 0.0 }
 0x5e5   : > { %v2242_v29 = vpop.eup %2241  ;;  %2122 = vmatpush3.bf16.msra.mxu0 %v2121_v8  ;;  %v2124_v35 = vpack.c.bf16 %v2240_v58, %v2238_v56  ;;  %v1569_v2 = vsel %vm609_vm3, %v2240_v58, 0.0 }
 0x5e6   : > { %v2244_v11 = vpop.eup %2243  ;;  %v1568_v12 = vadd.f32 %v1567_v9, %v1566_v47  ;;  %2123 = vmatprep.subr.bf16.mxu0 %v2316_v59  ;;  %v1571_v10 = vsel %vm609_vm3, %v2242_v29, 0.0 }
 0x5e7   : > { %v2246_v0 = vpop.eup %2245  ;;  %v2127_v4 = vpack.c.bf16 %v2244_v11, %v2242_v29  ;;  %v1573_v16 = vsel %vm609_vm3, %v2244_v11, 0.0 }
 0x5e8   : > { %v2248_v5 = vpop.eup %2247  ;;  %v1570_v7 = vadd.f32 %v1569_v2, %v1568_v12  ;;  %v1575_v19 = vsel %vm609_vm3, %v2246_v0, 0.0 }
 0x5e9   : > { %2125 = vmatpush3.bf16.msra.mxu0 %v2124_v35  ;;  %v2130_v13 = vpack.c.bf16 %v2248_v5, %v2246_v0  ;;  %v1577_v22 = vsel %vm609_vm3, %v2248_v5, 0.0 }
 0x5ea   : > { %v1572_v15 = vadd.f32 %v1571_v10, %v1570_v7  ;;  %2126 = vmatprep.subr.bf16.mxu0 %v2316_v59 }
 0x5ec   : > { %v1574_v17 = vadd.f32 %v1573_v16, %v1572_v15 }
 0x5ed   : > { %2128 = vmatpush3.bf16.msra.mxu0 %v2127_v4 }
 0x5ee   : > { %v1576_v20 = vadd.f32 %v1575_v19, %v1574_v17  ;;  %2129 = vmatprep.subr.bf16.mxu0 %v2316_v59 }
 0x5f0   : > { %v1578_v23 = vadd.f32 %v1577_v22, %v1576_v20 }
 0x5f1   : > { %2131 = vmatpush3.bf16.msra.mxu0 %v2130_v13 }
 0x5f2   : > { %v1579_v25 = vrot.slane %v1578_v23, 4 }
 0x5f4   : > { %2058 = vmatmul.mubr.msk.f32.vlgmr.msra.gmra.mrb[22].mxu0 %vm609_vm3, %v443_v24  ;;  %v1580_v26 = vadd.f32 %v1579_v25, %v1578_v23 }
 0x5f6   : > { %v1581_v30 = vrot.slane %v1580_v26, 2 }
 0x5f8   : > { %v1582_v31 = vadd.f32 %v1581_v30, %v1580_v26 }
 0x5fa   : > { %v1583_v32 = vrot.slane %v1582_v31, 1 }
 0x5fc   : > { %v1584_v33 = vadd.f32 %v1583_v32, %v1582_v31 }
 0x5fe   : > { %2249 = vrcp.f32 %v1584_v33 }
 0x608   : > { %v2250_v59 = vpop.eup %2249 }
 0x6c7   : > { %v1654_v57 = vpop.f32.mrb[22].mxu0 }
 0x6c8   : > { %v1659_v37 = vmul.f32 %v2250_v59, %v1654_v57  ;;  %v2059_v43 = vpop.f32.mrb[23].mxu0 }
 0x6ca   : > { %1663 = vst.msk [vmem:[%s2616_s9 + $0x18] sm:$0xff] %vm609_vm3, %v1659_v37 }
 0x6cb   : > { %2264 = shalt.err (!%p2261_p3)
}
 0x6cc   : > { %s2265_s5 = scalar_lea.hbm %s2730_s27, 512  ;;  %s2269_s9 = scalar_lea.hbm %s2781_s4, 1024 }
 0x6cd   : > { %p2266_p4 = scmp.ne.s32.totalorder %s2730_s27, %s2265_s5  ;;  %p2270_p9 = scmp.lt.u32.totalorder %s2730_s27, %s2781_s4 }
 0x6ce   : > { %p2271_p10 = scmp.lt.u32.totalorder %s2269_s9, %s2265_s5  ;;  %p2273_p12 = scmp.lt.u32.totalorder %s2265_s5, %s2730_s27 }
 0x6cf   : > { %p2267_p7 = pnand %p2266_p4, %p2385_p5 }
 0x6d0   : > { %p2272_p11 = por %p2271_p10, %p2270_p9 }
 0x6d1   : > { %p2268_p8 = pneg %p2267_p7 }
 0x6d2   : > { %p2274_p13 = por %p2273_p12, %p2272_p11 }
 0x6d4   : > { %p2275_p0 = pnand %p2274_p13, %p2268_p8 }
 0x6d6   : > { %2278 = shalt.err (!%p2275_p0)
}
 0x6d7   : > { %s2320_s12 = smov 128   ;;  %s2321_s13 = smov 8  }
 0x6d8   : > { %2132 = dma.vmem_to_hbm [thread:$0]  (%p2385_p5), %s2725_s14, 512, %s2730_s27, %s2736_s28, %s2320_s12, %s2320_s12, %s2321_s13  }
 0x6d9 PF: > { %p2138_p1 = scmp.ge.s32.totalorder %s2313_s18, 2  ;;  %s1693_s20 = sand.u32 1, %s2301_s15  }
 0x6da   : > { %s1694_s22 = scalar_lea.sflag [#allocation3], %s1693_s20 }
 0x6db   : > { %p2135_p2 = pnand %p2138_p1, %p2389_p6 }
 0x6dd   : > { %2296 = dma.done.wait (!%p2135_p2), %s1694_s22, 512  }
 0x6de   : > { %2298 = vsyncadd (!%p2135_p2), %s1694_s22, 4294966784  ;;  %p14_p3 = scmp.ge.s32.totalorder %s2372_s21, 4   ;;  %s2784_s15 = smov %s2305_s16 }
 0x6df   : > { %s2785_s16 = smov %s2309_s17  ;;  %s2786_s17 = smov %s2383_s24 }
 0x6e0   : > { %s2787_s18 = smov %s2372_s21  ;;  %16 = sbr.rel (!%p14_p3) target bundleno = 3 (0x3), region = 71 }
 0x6e7   :  { %1699 = vsyncpa [#allocation3], 1 }
 0x6e8   :  { %1701 = vsyncpa [#allocation3 + $0x1], 1 }

</bundles_post_ra>
